<compile_context>
chip_gen: v7x
topology: tpu7x:2x2x1
jax: 0.10.0
libtpu: 0.0.40
codegen_flags: <defaults>
</compile_context>

<pallas_src>
import numpy as np
import jax
import jax.numpy as jnp
from jax.experimental import pallas as pl
from jax.experimental.pallas import tpu as pltpu


def _round_up(x, m):
    return ((x + m - 1) // m) * m


# ----------------------------------------------------------------------------
# Kernel 1: SpatialNormer  (square -> 3x3x3 ones depthwise conv, stride 2 -> sqrt)
# ----------------------------------------------------------------------------
def _spatial_normer_kernel(a_ref, b_ref, c_ref, d_ref, o_ref):
    # Each ref: (c, H1, L) with L = pad128(BS*W1): all b*num_sigmas planes
    # concatenated along the lane dim.  A/B/C/D are the (even,even)/(even,odd)/
    # (odd,even)/(odd,odd) parity planes of the zero-padded input.
    def sqsum(ref):
        acc = ref[0].astype(jnp.float32) ** 2
        for ci in range(1, ref.shape[0]):
            acc = acc + ref[ci].astype(jnp.float32) ** 2
        return acc  # (H1, L)

    A = sqsum(a_ref)
    B = sqsum(b_ref)
    C = sqsum(c_ref)
    D = sqsum(d_ref)

    # 9-term 3x3 window sum factored into 4 adds and ONE lane shift:
    #   win[i, j] = (A+B+C+D)[i, j] + (A+C)[i, j+1] + (A+B)[i+1, j] + A[i+1, j+1]
    #             = (S0[i] + S2[i+1])[j] + shl(S1[i] + A[i+1])[j]
    S0 = A + B + C + D
    S1 = A + C          # consumed at column j+1
    S2 = A + B          # consumed at row i+1

    def shl(x):
        # out[:, l] = x[:, l+1]; the garbage crossing a plane boundary lands only
        # in the (discarded) j == new_w output column of each plane.
        return jnp.concatenate([x[:, 1:], jnp.zeros_like(x[:, :1])], axis=1)

    win = (S0[:-1, :] + S2[1:, :]) + shl(S1[:-1, :] + A[1:, :])
    o_ref[...] = jnp.sqrt(win)


def spatial_normer(x, kernel_size=3, stride=2, padding=1):
    """x: (b, s, c, h, w) -> (b, s, new_h, new_w).  Requires c == kernel_size."""
    assert kernel_size == 3 and stride == 2 and padding == 1
    b, s, c, h, w = x.shape
    assert c == kernel_size, "depth window must consume the whole c dim (squeeze(2))"
    new_h = (h + 2 * padding - kernel_size) // stride + 1
    new_w = (w + 2 * padding - kernel_size) // stride + 1
    H1, W1 = new_h + 1, new_w + 1
    hp2, wp2 = 2 * new_h + 2, 2 * new_w + 2
    bs = b * s
    L = bs * W1
    L_pad = _round_up(L, 128)   # lane-dense input loads / output store

    xp = jnp.pad(
        x.reshape(bs, c, h, w),
        ((0, 0), (0, 0),
         (padding, hp2 - h - padding),
         (padding, wp2 - w - padding)))
    xr = xp.reshape(bs, c, H1, 2, W1, 2)

    # Parity planes with the plane index folded into the lane dim: (c, H1, L_pad).
    def parity(i, j):
        p = jnp.transpose(xr[:, :, :, i, :, j], (1, 2, 0, 3)).reshape(c, H1, L)
        if L_pad != L:
            p = jnp.pad(p, ((0, 0), (0, 0), (0, L_pad - L)))
        return p

    A = parity(0, 0)
    B = parity(0, 1)
    C = parity(1, 0)
    D = parity(1, 1)

    # Whole op in a single grid step: full arrays resident in VMEM (a few hundred
    # KiB at realistic sizes).  TODO(synk): chunk the BS axis for very large b*s.
    out = pl.pallas_call(
        _spatial_normer_kernel,
        out_shape=jax.ShapeDtypeStruct((new_h, L_pad), jnp.float32),
    )(A, B, C, D)

    out = out[:, :L].reshape(new_h, bs, W1)[:, :, :new_w]    # drop invalid column
    out = jnp.transpose(out, (1, 0, 2)).reshape(b, s, new_h, new_w)
    return out.astype(x.dtype)


# ----------------------------------------------------------------------------
# Kernel 2: context encoder (Linear -> SiLU -> Linear) + diag-Gaussian log_prob
#           (transposed: samples on lanes, batch folded inside, lane-dense out)
# ----------------------------------------------------------------------------
def _logprob_kernel(p_ref, ctx_ref, w1t_ref, b1_ref, w2t_ref, b2_ref, o_ref):
    # p_ref: (B, d, tile)  ctx_ref: (cdim, tile)
    # w1t: (cdim, cdim)  b1: (cdim, 1)  w2t: (2d, cdim)  b2: (2d, 1)
    # o_ref: (B, tile)
    h = jnp.dot(w1t_ref[...], ctx_ref[...], preferred_element_type=jnp.float32)
    h = h + b1_ref[...]
    # SiLU = h * sigmoid(h); sigmoid via EUP tanh (no divide, no exp overflow).
    h = h * (0.5 * jnp.tanh(0.5 * h) + 0.5)
    enc = jnp.dot(w2t_ref[...], h.astype(w2t_ref.dtype),
                  preferred_element_type=jnp.float32) + b2_ref[...]

    d = p_ref.shape[1]
    mean = enc[:d, :]                      # (d, tile), shared across batch
    log_scale = enc[d:, :]                 # (d, tile), shared across batch
    inv_scale = jnp.exp(-log_scale)        # EUP, no divide
    base = (-0.5 * d * np.log(2.0 * np.pi)
            - jnp.sum(log_scale, axis=0, keepdims=True))      # (1, tile)

    z = p_ref[...].astype(jnp.float32)                        # (B, d, tile)
    diff = (z - mean[None, :, :]) * inv_scale[None, :, :]
    logp = base - 0.5 * jnp.sum(diff * diff, axis=1)          # (B, tile)
    o_ref[...] = logp.astype(o_ref.dtype)  # lane-dense store


def flow_log_prob(pT, ctxT, params, tile=None, use_bf16_matmul=False):
    """pT: (B, d, n_pos), ctxT: (cdim, n_pos)  ->  (B, n_pos) f32 log-probs.

    The context encoder depends only on the positional encoding, so mean /
    log_scale are computed once per position tile inside the kernel and reused
    for every batch element (batch is folded into the kernel, not the grid).
    """
    B, d, n_pos = pT.shape
    cdim = ctxT.shape[0]

    if tile is None:
        tile = min(1024, _round_up(n_pos, 128))   # big tiles amortize step overhead
    tile = max(128, _round_up(tile, 128))
    n_tiles = pl.cdiv(n_pos, tile)
    n_pad = n_tiles * tile
    if n_pad != n_pos:
        pT = jnp.pad(pT, ((0, 0), (0, 0), (0, n_pad - n_pos)))
        ctxT = jnp.pad(ctxT, ((0, 0), (0, n_pad - n_pos)))

    # Weights transposed so the sample axis stays on lanes inside the kernel.
    mm_dtype = jnp.bfloat16 if use_bf16_matmul else jnp.float32  # bf16: v6e/v7x MXU
    w1t = params["w1"].T.astype(mm_dtype)               # (cdim, cdim)
    w2t = params["w2"].T.astype(mm_dtype)               # (2d, cdim)
    b1c = params["b1"].reshape(cdim, 1).astype(jnp.float32)
    b2c = params["b2"].reshape(2 * d, 1).astype(jnp.float32)
    pT = pT.astype(jnp.float32)
    ctxT = ctxT.astype(mm_dtype)

    out = pl.pallas_call(
        _logprob_kernel,
        out_shape=jax.ShapeDtypeStruct((B, n_pad), jnp.float32),
        grid=(n_tiles,),
        in_specs=[
            pl.BlockSpec((B, d, tile), lambda ti: (0, 0, ti)),
            pl.BlockSpec((cdim, tile), lambda ti: (0, ti)),
            pl.BlockSpec((cdim, cdim), lambda ti: (0, 0)),
            pl.BlockSpec((cdim, 1), lambda ti: (0, 0)),
            pl.BlockSpec((2 * d, cdim), lambda ti: (0, 0)),
            pl.BlockSpec((2 * d, 1), lambda ti: (0, 0)),
        ],
        out_specs=pl.BlockSpec((B, tile), lambda ti: (0, ti)),
        compiler_params=pltpu.CompilerParams(
            dimension_semantics=("parallel",)),
    )(pT, ctxT, w1t, b1c, w2t, b2c)
    return out[:, :n_pos]


# ----------------------------------------------------------------------------
# Glue: PositionalEncoding2D (sin/cos table build) in plain JAX
# ----------------------------------------------------------------------------
def positional_encoding_2d(nh, nw, ctx_size, dtype=jnp.float32):
    channels = int(np.ceil(ctx_size / 4) * 2)
    assert 2 * channels == ctx_size, "context_embedding_size must be divisible by 4"
    inv_freq = jnp.asarray(
        1.0 / (10000.0 ** (np.arange(0, channels, 2, dtype=np.float32) / channels)))
    pos_x = jnp.arange(nh, dtype=jnp.float32)
    pos_y = jnp.arange(nw, dtype=jnp.float32)
    sin_inp_x = pos_x[:, None] * inv_freq[None, :]
    sin_inp_y = pos_y[:, None] * inv_freq[None, :]

    def get_emb(si):  # interleave sin / cos along last dim
        e = jnp.stack([jnp.sin(si), jnp.cos(si)], axis=-1)
        return e.reshape(si.shape[0], -1)

    emb_x = get_emb(sin_inp_x)[:, None, :]            # (nh, 1, channels)
    emb_y = get_emb(sin_inp_y)[None, :, :]            # (1, nw, channels)
    emb = jnp.zeros((nh, nw, 2 * channels), dtype)
    emb = emb.at[:, :, :channels].set(jnp.broadcast_to(emb_x, (nh, nw, channels)).astype(dtype))
    emb = emb.at[:, :, channels:].set(jnp.broadcast_to(emb_y, (nh, nw, channels)).astype(dtype))
    return emb


# ----------------------------------------------------------------------------
# PatchFlow.forward
# ----------------------------------------------------------------------------
def patch_flow_forward(x, params):
    b, s, c, h, w = x.shape
    x_norm = spatial_normer(x)                               # (b, s, nh, nw)
    nh, nw = x_norm.shape[2], x_norm.shape[3]
    ctx_size = params["ctx_size"]

    context = positional_encoding_2d(nh, nw, ctx_size, jnp.float32)   # (nh, nw, ctx)
    ctxT = context.reshape(nh * nw, ctx_size).T              # (ctx, n_pos), batch-shared
    pT = x_norm.reshape(b, s, nh * nw).astype(jnp.float32)   # (b, latent, n_pos)

    # TODO(synk): normflows transform layers skipped (external library); base
    # ConditionalDiagGaussian log_prob with the Linear-SiLU-Linear context encoder.
    logpx = flow_log_prob(pT, ctxT, params)                  # (b, n_pos)
    return logpx.reshape(b, 1, nh, nw)                       # 'b 1 h w'


def init_params(key, latent_size, ctx_size):
    # Deterministic init mimicking nn.Linear default (uniform(-1/sqrt(fan_in), ...)).
    k1, k2, k3, k4 = jax.random.split(key, 4)
    lim = 1.0 / np.sqrt(ctx_size)
    return dict(
        w1=jax.random.uniform(k1, (ctx_size, ctx_size), jnp.float32, -lim, lim),
        b1=jax.random.uniform(k2, (1, ctx_size), jnp.float32, -lim, lim),
        w2=jax.random.uniform(k3, (ctx_size, 2 * latent_size), jnp.float32, -lim, lim),
        b2=jax.random.uniform(k4, (1, 2 * latent_size), jnp.float32, -lim, lim),
        ctx_size=ctx_size,
    )


if __name__ == "__main__":
    key = jax.random.PRNGKey(0)
    kx, kp = jax.random.split(key)

    # input_size = (num_sigmas, c, h, w) = (4, 3, 16, 16), batch = 2
    b, num_sigmas, c, h, w = 2, 4, 3, 16, 16
    context_embedding_size = 64

    x = jax.random.normal(kx, (b, num_sigmas, c, h, w), jnp.float32)
    params = init_params(kp, latent_size=num_sigmas, ctx_size=context_embedding_size)

    out = patch_flow_forward(x, params)
    out = jax.block_until_ready(out)
    assert out.shape == (b, 1, 8, 8), out.shape
    assert out.dtype == jnp.float32
    assert bool(jnp.all(jnp.isfinite(out)))
    print("KERNEL_OK")
</pallas_src>

<mosaic_0001>
module attributes {stable_mosaic.version = 11 : i64} {
  func.func @_spatial_normer_kernel(%arg0: memref<3x9x128xf32, #tpu.memory_space<vmem>>, %arg1: memref<3x9x128xf32, #tpu.memory_space<vmem>>, %arg2: memref<3x9x128xf32, #tpu.memory_space<vmem>>, %arg3: memref<3x9x128xf32, #tpu.memory_space<vmem>>, %arg4: memref<8x128xf32, #tpu.memory_space<vmem>>) attributes {dimension_semantics = [], scalar_prefetch = 0 : i64, scratch_operands = 0 : i64, tpu.core_type = #tpu.core_type<tc>} {
    %c0 = arith.constant 0 : index
    %c0_0 = arith.constant 0 : index
    %c0_1 = arith.constant 0 : index
    %0 = vector.load %arg0[%c0, %c0_0, %c0_1] : memref<3x9x128xf32, #tpu.memory_space<vmem>>, vector<1x9x128xf32>
    %1 = vector.shape_cast %0 : vector<1x9x128xf32> to vector<9x128xf32>
    %2 = arith.mulf %1, %1 : vector<9x128xf32>
    %c1 = arith.constant 1 : index
    %c0_2 = arith.constant 0 : index
    %c0_3 = arith.constant 0 : index
    %3 = vector.load %arg0[%c1, %c0_2, %c0_3] : memref<3x9x128xf32, #tpu.memory_space<vmem>>, vector<1x9x128xf32>
    %4 = vector.shape_cast %3 : vector<1x9x128xf32> to vector<9x128xf32>
    %5 = arith.mulf %4, %4 : vector<9x128xf32>
    %6 = arith.addf %2, %5 : vector<9x128xf32>
    %c2 = arith.constant 2 : index
    %c0_4 = arith.constant 0 : index
    %c0_5 = arith.constant 0 : index
    %7 = vector.load %arg0[%c2, %c0_4, %c0_5] : memref<3x9x128xf32, #tpu.memory_space<vmem>>, vector<1x9x128xf32>
    %8 = vector.shape_cast %7 : vector<1x9x128xf32> to vector<9x128xf32>
    %9 = arith.mulf %8, %8 : vector<9x128xf32>
    %10 = arith.addf %6, %9 : vector<9x128xf32>
    %c0_6 = arith.constant 0 : index
    %c0_7 = arith.constant 0 : index
    %c0_8 = arith.constant 0 : index
    %11 = vector.load %arg1[%c0_6, %c0_7, %c0_8] : memref<3x9x128xf32, #tpu.memory_space<vmem>>, vector<1x9x128xf32>
    %12 = vector.shape_cast %11 : vector<1x9x128xf32> to vector<9x128xf32>
    %13 = arith.mulf %12, %12 : vector<9x128xf32>
    %c1_9 = arith.constant 1 : index
    %c0_10 = arith.constant 0 : index
    %c0_11 = arith.constant 0 : index
    %14 = vector.load %arg1[%c1_9, %c0_10, %c0_11] : memref<3x9x128xf32, #tpu.memory_space<vmem>>, vector<1x9x128xf32>
    %15 = vector.shape_cast %14 : vector<1x9x128xf32> to vector<9x128xf32>
    %16 = arith.mulf %15, %15 : vector<9x128xf32>
    %17 = arith.addf %13, %16 : vector<9x128xf32>
    %c2_12 = arith.constant 2 : index
    %c0_13 = arith.constant 0 : index
    %c0_14 = arith.constant 0 : index
    %18 = vector.load %arg1[%c2_12, %c0_13, %c0_14] : memref<3x9x128xf32, #tpu.memory_space<vmem>>, vector<1x9x128xf32>
    %19 = vector.shape_cast %18 : vector<1x9x128xf32> to vector<9x128xf32>
    %20 = arith.mulf %19, %19 : vector<9x128xf32>
    %21 = arith.addf %17, %20 : vector<9x128xf32>
    %c0_15 = arith.constant 0 : index
    %c0_16 = arith.constant 0 : index
    %c0_17 = arith.constant 0 : index
    %22 = vector.load %arg2[%c0_15, %c0_16, %c0_17] : memref<3x9x128xf32, #tpu.memory_space<vmem>>, vector<1x9x128xf32>
    %23 = vector.shape_cast %22 : vector<1x9x128xf32> to vector<9x128xf32>
    %24 = arith.mulf %23, %23 : vector<9x128xf32>
    %c1_18 = arith.constant 1 : index
    %c0_19 = arith.constant 0 : index
    %c0_20 = arith.constant 0 : index
    %25 = vector.load %arg2[%c1_18, %c0_19, %c0_20] : memref<3x9x128xf32, #tpu.memory_space<vmem>>, vector<1x9x128xf32>
    %26 = vector.shape_cast %25 : vector<1x9x128xf32> to vector<9x128xf32>
    %27 = arith.mulf %26, %26 : vector<9x128xf32>
    %28 = arith.addf %24, %27 : vector<9x128xf32>
    %c2_21 = arith.constant 2 : index
    %c0_22 = arith.constant 0 : index
    %c0_23 = arith.constant 0 : index
    %29 = vector.load %arg2[%c2_21, %c0_22, %c0_23] : memref<3x9x128xf32, #tpu.memory_space<vmem>>, vector<1x9x128xf32>
    %30 = vector.shape_cast %29 : vector<1x9x128xf32> to vector<9x128xf32>
    %31 = arith.mulf %30, %30 : vector<9x128xf32>
    %32 = arith.addf %28, %31 : vector<9x128xf32>
    %c0_24 = arith.constant 0 : index
    %c0_25 = arith.constant 0 : index
    %c0_26 = arith.constant 0 : index
    %33 = vector.load %arg3[%c0_24, %c0_25, %c0_26] : memref<3x9x128xf32, #tpu.memory_space<vmem>>, vector<1x9x128xf32>
    %34 = vector.shape_cast %33 : vector<1x9x128xf32> to vector<9x128xf32>
    %35 = arith.mulf %34, %34 : vector<9x128xf32>
    %c1_27 = arith.constant 1 : index
    %c0_28 = arith.constant 0 : index
    %c0_29 = arith.constant 0 : index
    %36 = vector.load %arg3[%c1_27, %c0_28, %c0_29] : memref<3x9x128xf32, #tpu.memory_space<vmem>>, vector<1x9x128xf32>
    %37 = vector.shape_cast %36 : vector<1x9x128xf32> to vector<9x128xf32>
    %38 = arith.mulf %37, %37 : vector<9x128xf32>
    %39 = arith.addf %35, %38 : vector<9x128xf32>
    %c2_30 = arith.constant 2 : index
    %c0_31 = arith.constant 0 : index
    %c0_32 = arith.constant 0 : index
    %40 = vector.load %arg3[%c2_30, %c0_31, %c0_32] : memref<3x9x128xf32, #tpu.memory_space<vmem>>, vector<1x9x128xf32>
    %41 = vector.shape_cast %40 : vector<1x9x128xf32> to vector<9x128xf32>
    %42 = arith.mulf %41, %41 : vector<9x128xf32>
    %43 = arith.addf %39, %42 : vector<9x128xf32>
    %44 = arith.addf %10, %21 : vector<9x128xf32>
    %45 = arith.addf %44, %32 : vector<9x128xf32>
    %46 = arith.addf %45, %43 : vector<9x128xf32>
    %47 = arith.addf %10, %32 : vector<9x128xf32>
    %48 = arith.addf %10, %21 : vector<9x128xf32>
    %49 = vector.extract_strided_slice %46 {offsets = [0, 0], sizes = [8, 128], strides = [1, 1]} : vector<9x128xf32> to vector<8x128xf32>
    %50 = vector.extract_strided_slice %48 {offsets = [1, 0], sizes = [8, 128], strides = [1, 1]} : vector<9x128xf32> to vector<8x128xf32>
    %51 = arith.addf %49, %50 : vector<8x128xf32>
    %52 = vector.extract_strided_slice %47 {offsets = [0, 0], sizes = [8, 128], strides = [1, 1]} : vector<9x128xf32> to vector<8x128xf32>
    %53 = vector.extract_strided_slice %10 {offsets = [1, 0], sizes = [8, 128], strides = [1, 1]} : vector<9x128xf32> to vector<8x128xf32>
    %54 = arith.addf %52, %53 : vector<8x128xf32>
    %55 = vector.extract_strided_slice %54 {offsets = [0, 1], sizes = [8, 127], strides = [1, 1]} : vector<8x128xf32> to vector<8x127xf32>
    %cst = arith.constant 0.000000e+00 : f32
    %56 = vector.broadcast %cst : f32 to vector<8x1xf32>
    %57 = tpu.concatenate %55, %56 in 1 : vector<8x127xf32>, vector<8x1xf32> -> vector<8x128xf32>
    %58 = arith.addf %51, %57 : vector<8x128xf32>
    %59 = math.sqrt %58 : vector<8x128xf32>
    %c0_33 = arith.constant 0 : index
    %c0_34 = arith.constant 0 : index
    %60 = vector.load %arg4[%c0_33, %c0_34] : memref<8x128xf32, #tpu.memory_space<vmem>>, vector<8x128xf32>
    tpu.vector_store %arg4[%c0_33, %c0_34], %59 {strides = array<i32>} : memref<8x128xf32, #tpu.memory_space<vmem>>, vector<8x128xf32>,
    return
  }
}

</mosaic_0001>

<bundles_post_ra>
// kernel: tpu_custom_call.1
= control target key start
LH: loop header
LB: loop body
LE: loop exit
PB: predicated region body
PF: predicated region fallthrough
CT: control target
= control target key end

     0   :  { %vm81_vm0 = vcmask 1046528   ;;  %s258_s0 = inlined_call_operand.vmem [shape: f32[3,9,128], index: 0, kind: input, shape index: {}]   ;;  %s259_s1 = inlined_call_operand.vmem [shape: f32[3,9,128], index: 1, kind: input, shape index: {}]   ;;  %s260_s2 = inlined_call_operand.vmem [shape: f32[3,9,128], index: 2, kind: input, shape index: {}]   ;;  %s261_s3 = inlined_call_operand.vmem [shape: f32[3,9,128], index: 3, kind: input, shape index: {}]   ;;  %s262_s4 = inlined_call_operand.hbm [shape: f32[8,128], index: 4, kind: output, shape index: {}]  }
   0x1   :  { %v18_v0 = vld [vmem:[%s258_s0] sm:$0xff]  ;;  %v19_v1 = vld [vmem:[%s258_s0 + $0x8] sm:$0x1]  ;;  %v123_v2 = vld [vmem:[%s258_s0 + $0x10] sm:$0xff] }
   0x2   :  { %v20_v3 = vmul.f32 %v18_v0, %v18_v0  ;;  %v21_v4 = vmul.f32 %v19_v1, %v19_v1  ;;  %v124_v5 = vld [vmem:[%s258_s0 + $0x18] sm:$0x1]  ;;  %v25_v6 = vmul.f32 %v123_v2, %v123_v2  ;;  %v125_v7 = vld [vmem:[%s258_s0 + $0x20] sm:$0xff]  ;;  %v126_v8 = vld [vmem:[%s258_s0 + $0x28] sm:$0x1] }
   0x3   :  { %v26_v9 = vmul.f32 %v124_v5, %v124_v5  ;;  %v32_v10 = vmul.f32 %v125_v7, %v125_v7  ;;  %v33_v11 = vmul.f32 %v126_v8, %v126_v8  ;;  %v54_v12 = vld [vmem:[%s260_s2] sm:$0xff]  ;;  %v131_v13 = vld [vmem:[%s260_s2 + $0x10] sm:$0xff]  ;;  %v37_v20 = vld [vmem:[%s259_s1 + $0x8] sm:$0x1] }
   0x4   :  { %v132_v14 = vld [vmem:[%s260_s2 + $0x20] sm:$0xff]  ;;  %v27_v15 = vadd.f32 %v25_v6, %v20_v3  ;;  %v55_v16 = vmul.f32 %v54_v12, %v54_v12  ;;  %v58_v17 = vmul.f32 %v131_v13, %v131_v13  ;;  %v127_v21 = vld [vmem:[%s259_s1 + $0x10] sm:$0xff]  ;;  %v39_v24 = vmul.f32 %v37_v20, %v37_v20  ;;  %v128_v25 = vld [vmem:[%s259_s1 + $0x18] sm:$0x1] }
   0x5   :  { %v62_v18 = vmul.f32 %v132_v14, %v132_v14  ;;  %v36_v19 = vld [vmem:[%s259_s1] sm:$0xff]  ;;  %v28_v22 = vadd.f32 %v26_v9, %v21_v4  ;;  %v43_v26 = vmul.f32 %v127_v21, %v127_v21  ;;  %v130_v28 = vld [vmem:[%s259_s1 + $0x28] sm:$0x1]  ;;  %v44_v31 = vmul.f32 %v128_v25, %v128_v25  ;;  %v133_v34 = vld [vmem:[%s261_s3 + $0x10] sm:$0xff] }
   0x6   :  { %v38_v23 = vmul.f32 %v36_v19, %v36_v19  ;;  %v129_v27 = vld [vmem:[%s259_s1 + $0x20] sm:$0xff]  ;;  %v34_v29 = vadd.f32 %v32_v10, %v27_v15  ;;  %v59_v30 = vadd.f32 %v58_v17, %v55_v16  ;;  %v51_v38 = vmul.f32 %v130_v28, %v130_v28 }
   0x7   :  { %v50_v32 = vmul.f32 %v129_v27, %v129_v27  ;;  %v64_v33 = vld [vmem:[%s261_s3] sm:$0xff]  ;;  %v35_v36 = vadd.f32 %v33_v11, %v28_v22 }
   0x8   :  { %v134_v35 = vld [vmem:[%s261_s3 + $0x20] sm:$0xff]  ;;  %v45_v37 = vadd.f32 %v43_v26, %v38_v23  ;;  %v65_v39 = vmul.f32 %v64_v33, %v64_v33 }
   0x9   :  { %9 = vsyncpa [#allocation3], 0  ;;  %v63_v40 = vadd.f32 %v62_v18, %v59_v30  ;;  %v89_v41 = vrot.slane %v34_v29, 1  ;;  %v46_v42 = vadd.f32 %v44_v31, %v39_v24  ;;  %v68_v43 = vmul.f32 %v133_v34, %v133_v34  ;;  %s163_s1 = smov 127   ;;  %s164_s3 = smov [#allocation2]  }
   0xa   :  { %v90_v44 = vrot.slane %v35_v36, 1  ;;  %v52_v45 = vadd.f32 %v50_v32, %v45_v37  ;;  %v72_v46 = vmul.f32 %v134_v35, %v134_v35  ;;  %vm98_vm1 = vcmask 1039360   ;;  %s115_s23 = sshll.u32 %s164_s3, 4  ;;  %s116_s23 = int_to_ptr.vmem [resolvable:$true] %s115_s23 }
   0xb   :  { %v78_v47 = vadd.f32 %v63_v40, %v34_v29  ;;  %v53_v48 = vadd.f32 %v51_v38, %v46_v42  ;;  %v69_v49 = vadd.f32 %v68_v43, %v65_v39  ;;  %s139_s24 = scalar_lea.vmem %s116_s23, 128  ;;  %p144_p1 = scmp.lt.s32.totalorder %s116_s23, %s116_s23 }
   0xc   :  { %v91_v50 = vsel %vm81_vm0, %v89_v41, %v90_v44  ;;  %v74_v51 = vadd.f32 %v52_v45, %v34_v29  ;;  %p140_p0 = scmp.ne.s32.totalorder %s116_s23, %s139_s24  ;;  %p145_p2 = scmp.lt.s32.totalorder %s139_s24, %s139_s24 }
   0xd   :  { %v93_v52 = vadd.f32 %v91_v50, %v78_v47  ;;  %v73_v53 = vadd.f32 %v72_v46, %v69_v49  ;;  %v75_v54 = vadd.f32 %v53_v48, %v35_v36 }
   0xe   :  { %v76_v55 = vadd.f32 %v74_v51, %v63_v40  ;;  %v82_v56 = vrot.slane %v74_v51, 1  ;;  %p146_p3 = por %p145_p2, %p144_p1 }
   0xf   :  { %95 = vrot.lane.b32.xlu0 %v93_v52, %s163_s1  ;;  %v83_v57 = vrot.slane %v75_v54, 1 }
  0x10   :  { %v77_v58 = vadd.f32 %v76_v55, %v73_v53  ;;  %p147_p4 = pnand %p146_p3, %p140_p0 }
  0x11   :  { %v84_v59 = vsel %vm81_vm0, %v82_v56, %v83_v57 }
  0x12   :  { %v86_v60 = vadd.f32 %v84_v59, %v77_v58 }
  0x81   :  { %v96_v61 = vpop.permute.xlu0 %95 }
  0x82   :  { %v99_v62 = vsel %vm98_vm1, %v96_v61, 0.0 }
  0x83   :  { %v100_v63 = vadd.f32 %v99_v62, %v86_v60 }
  0x85   :  { %137 = vrsqrt.f32 %v100_v63  ;;  %vm103_vm2 = vcmp.eq.f32.partialorder %v100_v63, inf  ;;  %v106_v2 = vand.u32 2147483648, %v100_v63  ;;  %vm105_vm3 = vcmp.eq.f32.partialorder %v100_v63, 0.0 }
  0x8f   :  { %v138_v0 = vpop.eup %137 }
  0x90   :  { %v102_v1 = vmul.f32 %v138_v0, %v100_v63 }
  0x92   :  { %v104_v3 = vsel %vm103_vm2, %v100_v63, %v102_v1 }
  0x93   :  { %v107_v4 = vsel %vm105_vm3, %v106_v2, %v104_v3 }
  0x94   :  { %108 = vst [vmem:[#allocation2] sm:$0xff] %v107_v4 }
  0x95   :  { %150 = shalt.err (!%p147_p4)
}
  0x96   :  { %s151_s27 = scalar_lea.hbm %s262_s4, 128 }
  0x97   :  { %p152_p5 = scmp.ne.s32.totalorder %s262_s4, %s151_s27  ;;  %p155_p6 = scmp.lt.u32.totalorder %s151_s27, %s262_s4 }
  0x99   :  { %p157_p7 = pnand %p155_p6, %p152_p5 }
  0x9b   :  { %160 = shalt.err (!%p157_p7)
}
  0x9c   :  { %118 = dma.vmem_to_hbm [thread:$0]  %s116_s23, 128, %s262_s4, [#allocation3]  }
  0x9d   :  { %161 = dma.done.wait [#allocation3], 128  }
  0x9e   :  { %162 = vsyncadd [#allocation3], 4294967168 }
  0x9f   :  { %122 = vsyncpa [#allocation3], 1 }

</bundles_post_ra>
